<compile_context>
chip_gen: v7x
topology: tpu7x:2x2x1
jax: 0.10.0
libtpu: 0.0.40
codegen_flags: <defaults>
</compile_context>

<pallas_src>
import functools
import math

import jax
import jax.numpy as jnp
import numpy as np
from jax.experimental import pallas as pl
from jax.experimental.pallas import tpu as pltpu

_SUBLANE = 8
_LANES = 128


def _round_up(n, m):
    return ((n + m - 1) // m) * m


def _pick_block_rows():
    """Rows (of 128 lanes) per grid step, sized per TPU generation.

    Double-buffered VMEM footprint per step is
      2 * (2*128*4 B in + 128*4 B out) * rows = 3 KiB * rows,
    i.e. ~12 MiB at 4096 rows / ~6 MiB at 2048 rows -- inside the default
    scoped-VMEM limits on every generation (32 MiB default on v7x).
    """
    try:
        vmem = int(getattr(pltpu.get_tpu_info(), "vmem_capacity_bytes", 0))
    except Exception:
        vmem = 0
    if vmem and vmem <= (64 << 20):      # v7x-class: 64 MiB VMEM per TensorCore
        return 2048                      # 256K elems / 2 MiB input per block
    return 4096                          # 512K elems / 4 MiB input per block


def _act_kernel(goal_ref, act_ref, *, tan_thresh):
    """Heuristic-action decision on one sublane+lane-dense tile.

    goal_ref: (2, rows, 128) f32 -- plane 0 = goal_x, plane 1 = goal_y
    act_ref:  (rows, 128) i32    -- 0 = forward, 1 = turn left, 2 = turn right
    """
    x = goal_ref[0]                         # (rows, 128)
    y = goal_ref[1]                         # (rows, 128)

    # Bit view gives signbit (distinguishes -0.0) and "is +0.0" in one compare each.
    xb = pltpu.bitcast(x, jnp.int32)
    yb = pltpu.bitcast(y, jnp.int32)
    y_zero = y == 0.0

    # |atan2(y, x)| <= T with T < pi/2:
    #   x > 0 and |y| <= x * tan(T),   or   x == +0 and y == +-0  (phi = +-0).
    # TODO(synk): x = y = +inf gives phi = pi/4 (not fwd) in the reference; this
    # reformulation calls it fwd.  Non-physical input, left unhandled.
    fwd = ((x > 0.0) & (jnp.abs(y) <= x * tan_thresh)) | ((xb == 0) & y_zero)

    # atan2(y, x) < 0  <=>  y < 0,  or  y == -0.0 and x in (-inf, -0.0]  (phi = -pi).
    # (xb < 0  <=>  sign bit set  <=>  x < 0 or x == -0.0, within the non-NaN domain.)
    phi_neg = (yb < 0) & ((xb < 0) | ~y_zero)

    # NaN in either coordinate -> every reference flag False -> action 0.
    invalid = jnp.isnan(x) | jnp.isnan(y)
    turn = ~(fwd | invalid)

    # fwd / NaN -> 0, left (phi < 0) -> 1, right -> 2.  Inside `turn`, phi != 0, so
    # "not left" is exactly "right"; no second full predicate needed.
    act_ref[...] = jnp.where(turn, jnp.where(phi_neg, 1, 2), 0).astype(jnp.int32)


def heuristic_local_policy_act(inputs, rnn_hxs, prev_actions, masks,
                               turn_angle_deg, deterministic=False,
                               coord_major=False, block_rows=None):
    """JAX/Pallas equivalent of HeuristicLocalPolicy.act.

    Returns (None, action, None, rnn_hxs), matching the PyTorch module.
    `action` is (B, 1) int32.  If `coord_major=True`, inputs['goal_at_t'] is taken
    as an already coord-major (2, B) buffer (fast path: no transpose copy).
    """
    # 0.9 * turn_angle must stay below pi/2 for the tan() reformulation.
    assert 0.0 < turn_angle_deg < 100.0, "turn_angle must be in (0, 100) degrees"
    tan_thresh = math.tan(0.9 * math.radians(turn_angle_deg))

    goal = inputs["goal_at_t"]
    if goal.dtype != jnp.float32:
        goal = goal.astype(jnp.float32)

    if coord_major:
        assert goal.ndim == 2 and goal.shape[0] == 2
        B = goal.shape[1]
        goal_t = goal                               # (2, B), no copy
    else:
        assert goal.ndim == 2 and goal.shape[1] == 2
        B = goal.shape[0]
        goal_t = goal.T                             # (2, B); XLA fuses with pad below

    # Pad only to the 128-lane boundary (<= 127 extra entries); the rows axis uses
    # pl.cdiv partial blocks instead of padding.  Zero pad -> action 0, and the
    # [:B] slice below discards it anyway.
    b_pad = _round_up(B, _LANES)
    if b_pad != B:
        goal_t = jnp.pad(goal_t, ((0, 0), (0, b_pad - B)))
    rows = b_pad // _LANES
    goal3 = goal_t.reshape(2, rows, _LANES)         # free metadata reshape

    if block_rows is None:
        block_rows = _pick_block_rows()
    block_rows = max(_SUBLANE, _round_up(int(block_rows), _SUBLANE))

    kernel = functools.partial(_act_kernel, tan_thresh=tan_thresh)
    out_shape = jax.ShapeDtypeStruct((rows, _LANES), jnp.int32)

    if rows <= block_rows:
        # Small/medium batch: single gridless tile, no pipeline bookkeeping.
        act2d = pl.pallas_call(kernel, out_shape=out_shape)(goal3)
    else:
        # Large batch: 1-D row-tiled grid (>= 2 blocks by construction), marked
        # "parallel" so the two v7x TensorCores shard it (no-op on v5e/v6e).
        act2d = pl.pallas_call(
            kernel,
            out_shape=out_shape,
            grid=(pl.cdiv(rows, block_rows),),
            in_specs=[pl.BlockSpec((2, block_rows, _LANES), lambda i: (0, i, 0))],
            out_specs=pl.BlockSpec((block_rows, _LANES), lambda i: (i, 0)),
            compiler_params=pltpu.CompilerParams(
                dimension_semantics=("parallel",)),
        )(goal3)

    action = act2d.reshape(b_pad)[:B].reshape(B, 1)
    return None, action, None, rnn_hxs


def _reference_act(goal_xy_np, turn_angle_deg):
    """Pure-numpy reference mirroring the PyTorch code path."""
    goal_phi = np.arctan2(goal_xy_np[:, 1], goal_xy_np[:, 0])
    T = 0.9 * math.radians(turn_angle_deg)
    fwd = np.abs(goal_phi) <= T
    left = (~fwd) & (goal_phi < 0)
    right = (~fwd) & (goal_phi > 0)
    action = np.zeros((goal_xy_np.shape[0], 1), dtype=np.int64)
    action[fwd] = 0
    action[left] = 1
    action[right] = 2
    return action


if __name__ == "__main__":
    # Synthetic config: AGENT_DYNAMICS.turn_angle = 10 degrees.
    turn_angle_deg = 10.0

    B, H = 8, 32
    key = jax.random.PRNGKey(0)
    k_goal, k_hxs = jax.random.split(key)

    goal_at_t = jax.random.normal(k_goal, (B, 2), dtype=jnp.float32)
    rnn_hxs = jax.random.normal(k_hxs, (B, H), dtype=jnp.float32)
    prev_actions = jnp.zeros((B, 1), dtype=jnp.int32)
    masks = jnp.ones((B, 1), dtype=jnp.float32)

    _, action, _, rnn_hxs_out = heuristic_local_policy_act(
        {"goal_at_t": goal_at_t}, rnn_hxs, prev_actions, masks, turn_angle_deg)
    action = jax.block_until_ready(action)
    expected = _reference_act(np.asarray(goal_at_t), turn_angle_deg)
    assert action.shape == (B, 1)
    assert np.array_equal(np.asarray(action, dtype=np.int64), expected), (
        f"mismatch: got {np.asarray(action).ravel()} expected {expected.ravel()}")
    assert rnn_hxs_out is rnn_hxs  # hidden state passed through unchanged

    # Edge cases: signed zeros, axis-aligned goals, NaNs (gridless path, padded).
    edge = np.array([
        [1.0, 0.0], [1.0, -0.0], [-1.0, 0.0], [-1.0, -0.0],
        [0.0, 0.0], [0.0, -0.0], [-0.0, 0.0], [-0.0, -0.0],
        [0.0, 2.0], [0.0, -2.0], [np.nan, 1.0], [1.0, np.nan],
        [5.0, 0.1], [5.0, -0.1], [-3.0, 0.5], [-3.0, -0.5],
    ], dtype=np.float32)
    _, act_edge, _, _ = heuristic_local_policy_act(
        {"goal_at_t": jnp.asarray(edge)}, None, None, None, turn_angle_deg)
    act_edge = jax.block_until_ready(act_edge)
    exp_edge = _reference_act(edge, turn_angle_deg)
    assert np.array_equal(np.asarray(act_edge, dtype=np.int64), exp_edge), (
        f"edge mismatch: got {np.asarray(act_edge).ravel()} "
        f"expected {exp_edge.ravel()}")

    # Medium batch: default config (gridless, sublane-dense tile, 128-lane pad).
    B_big = 5000
    goal_big = jax.random.normal(jax.random.PRNGKey(1), (B_big, 2),
                                 dtype=jnp.float32)
    exp_big = _reference_act(np.asarray(goal_big), turn_angle_deg)

    _, act_big, _, _ = heuristic_local_policy_act(
        {"goal_at_t": goal_big}, None, None, None, turn_angle_deg)
    act_big = jax.block_until_ready(act_big)
    assert act_big.shape == (B_big, 1)
    assert np.array_equal(np.asarray(act_big, dtype=np.int64), exp_big)

    # Same batch through the tiled "parallel" grid path with a small block so the
    # grid code path (including the partial final block) is exercised cheaply.
    _, act_grid, _, _ = heuristic_local_policy_act(
        {"goal_at_t": goal_big}, None, None, None, turn_angle_deg, block_rows=16)
    act_grid = jax.block_until_ready(act_grid)
    assert np.array_equal(np.asarray(act_grid, dtype=np.int64), exp_big)

    # Coord-major fast path (producer hands over (2, B) directly; no transpose copy).
    _, act_cm, _, _ = heuristic_local_policy_act(
        {"goal_at_t": goal_big.T}, None, None, None, turn_angle_deg,
        coord_major=True)
    act_cm = jax.block_until_ready(act_cm)
    assert np.array_equal(np.asarray(act_cm, dtype=np.int64), exp_big)

    print("KERNEL_OK")
</pallas_src>

<mosaic_0001>
module attributes {stable_mosaic.version = 11 : i64} {
  func.func @_act_kernel(%arg0: memref<2x1x128xf32, #tpu.memory_space<vmem>>, %arg1: memref<1x128xi32, #tpu.memory_space<vmem>>) attributes {dimension_semantics = [], scalar_prefetch = 0 : i64, scratch_operands = 0 : i64, tpu.core_type = #tpu.core_type<tc>} {
    %c0 = arith.constant 0 : index
    %c0_0 = arith.constant 0 : index
    %c0_1 = arith.constant 0 : index
    %0 = vector.load %arg0[%c0, %c0_0, %c0_1] : memref<2x1x128xf32, #tpu.memory_space<vmem>>, vector<1x1x128xf32>
    %1 = vector.shape_cast %0 : vector<1x1x128xf32> to vector<1x128xf32>
    %c1 = arith.constant 1 : index
    %c0_2 = arith.constant 0 : index
    %c0_3 = arith.constant 0 : index
    %2 = vector.load %arg0[%c1, %c0_2, %c0_3] : memref<2x1x128xf32, #tpu.memory_space<vmem>>, vector<1x1x128xf32>
    %3 = vector.shape_cast %2 : vector<1x1x128xf32> to vector<1x128xf32>
    %4 = tpu.bitcast %1 : vector<1x128xf32> -> vector<1x128xi32>
    %5 = tpu.bitcast %3 : vector<1x128xf32> -> vector<1x128xi32>
    %cst = arith.constant 0.000000e+00 : f32
    %6 = vector.broadcast %cst : f32 to vector<1x128xf32>
    %7 = arith.cmpf oeq, %3, %6 : vector<1x128xf32>
    %cst_4 = arith.constant 0.000000e+00 : f32
    %8 = vector.broadcast %cst_4 : f32 to vector<1x128xf32>
    %9 = arith.cmpf ogt, %1, %8 : vector<1x128xf32>
    %10 = math.absf %3 : vector<1x128xf32>
    %cst_5 = arith.constant 0.158384442 : f32
    %11 = vector.broadcast %cst_5 : f32 to vector<1x128xf32>
    %12 = arith.mulf %1, %11 : vector<1x128xf32>
    %13 = arith.cmpf ole, %10, %12 : vector<1x128xf32>
    %14 = arith.andi %9, %13 : vector<1x128xi1>
    %c0_i32 = arith.constant 0 : i32
    %15 = vector.broadcast %c0_i32 : i32 to vector<1x128xi32>
    %16 = arith.cmpi eq, %4, %15 : vector<1x128xi32>
    %17 = arith.andi %16, %7 : vector<1x128xi1>
    %18 = arith.ori %14, %17 : vector<1x128xi1>
    %c0_i32_6 = arith.constant 0 : i32
    %19 = vector.broadcast %c0_i32_6 : i32 to vector<1x128xi32>
    %20 = arith.cmpi slt, %5, %19 : vector<1x128xi32>
    %c0_i32_7 = arith.constant 0 : i32
    %21 = vector.broadcast %c0_i32_7 : i32 to vector<1x128xi32>
    %22 = arith.cmpi slt, %4, %21 : vector<1x128xi32>
    %cst_8 = arith.constant dense<true> : vector<1x128xi1>
    %23 = arith.xori %7, %cst_8 : vector<1x128xi1>
    %24 = arith.ori %22, %23 : vector<1x128xi1>
    %25 = arith.andi %20, %24 : vector<1x128xi1>
    %26 = arith.cmpf one, %1, %1 : vector<1x128xf32>
    %27 = arith.cmpf one, %3, %3 : vector<1x128xf32>
    %28 = arith.ori %26, %27 : vector<1x128xi1>
    %29 = arith.ori %18, %28 : vector<1x128xi1>
    %cst_9 = arith.constant dense<true> : vector<1x128xi1>
    %30 = arith.xori %29, %cst_9 : vector<1x128xi1>
    %c1_i32 = arith.constant 1 : i32
    %c2_i32 = arith.constant 2 : i32
    %31 = vector.broadcast %c1_i32 : i32 to vector<1x128xi32>
    %32 = vector.broadcast %c2_i32 : i32 to vector<1x128xi32>
    %33 = arith.select %25, %31, %32 : vector<1x128xi1>, vector<1x128xi32>
    %c0_i32_10 = arith.constant 0 : i32
    %34 = vector.broadcast %c0_i32_10 : i32 to vector<1x128xi32>
    %35 = arith.select %30, %33, %34 : vector<1x128xi1>, vector<1x128xi32>
    %c0_11 = arith.constant 0 : index
    %c0_12 = arith.constant 0 : index
    %36 = vector.load %arg1[%c0_11, %c0_12] : memref<1x128xi32, #tpu.memory_space<vmem>>, vector<1x128xi32>
    tpu.vector_store %arg1[%c0_11, %c0_12], %35 {strides = array<i32>} : memref<1x128xi32, #tpu.memory_space<vmem>>, vector<1x128xi32>,
    return
  }
}

</mosaic_0001>

<bundles_post_ra>
// kernel: tpu_custom_call.1
= control target key start
LH: loop header
LB: loop body
LE: loop exit
PB: predicated region body
PF: predicated region fallthrough
CT: control target
= control target key end

     0   :  { %6 = vsyncpa [#allocation3], 0  ;;  %s167_s0 = inlined_call_operand.hbm [shape: f32[2,1,128], index: 0, kind: input, shape index: {}]   ;;  %s168_s1 = inlined_call_operand.hbm [shape: s32[1,128], index: 1, kind: output, shape index: {}]  }
   0x1   :  { %7 = vsyncpa [#allocation4], 0  ;;  %s119_s6 = smov [#allocation2]   ;;  %s71_s10 = scalar_lea.hbm %s167_s0, 32 }
   0x2   :  { %s13_s7 = sshll.u32 %s119_s6, 4  ;;  %p72_p0 = scmp.ne.s32.totalorder %s167_s0, %s71_s10  ;;  %s14_s7 = int_to_ptr.vmem [resolvable:$true] %s13_s7 }
   0x3   :  { %p75_p1 = scmp.lt.u32.totalorder %s71_s10, %s167_s0 }
   0x5   :  { %p77_p2 = pnand %p75_p1, %p72_p0 }
   0x7   :  { %80 = shalt.err (!%p77_p2)
}
   0x8   :  { %s81_s15 = scalar_lea.vmem %s14_s7, 32  ;;  %p86_p4 = scmp.lt.s32.totalorder %s14_s7, %s14_s7 }
   0x9   :  { %p82_p3 = scmp.ne.s32.totalorder %s14_s7, %s81_s15  ;;  %p87_p5 = scmp.lt.s32.totalorder %s81_s15, %s81_s15 }
   0xb   :  { %p88_p6 = por %p87_p5, %p86_p4 }
   0xd   :  { %p89_p7 = pnand %p88_p6, %p82_p3 }
   0xf   :  { %92 = shalt.err (!%p89_p7)
}
  0x10   :  { %s120_s16 = smov 16   ;;  %s121_s17 = smov 1  }
  0x11   :  { %19 = dma.hbm_to_vmem [thread:$0]  %s167_s0, 32, %s14_s7, [#allocation3], %s120_s16, %s120_s16, %s121_s17  }
  0x12   :  { %115 = dma.done.wait [#allocation3], 32  }
  0x13   :  { %116 = vsyncadd [#allocation3], 4294967264  ;;  %v23_v0 = vld [vmem:[#allocation2] sm:$0x1]  ;;  %v25_v1 = vld [vmem:[#allocation2 + $0x1] sm:$0x1] }
  0x14   :  { %vm28_vm0 = vcmp.eq.f32.partialorder %v25_v1, 0.0  ;;  %vm29_vm1 = vcmp.gt.f32.partialorder %v23_v0, 0.0  ;;  %v30_v2 = vand.u32 2147483647, %v25_v1  ;;  %v31_v3 = vmul.f32 0.15838444, %v23_v0 }
  0x15   :  { %vm34_vm2 = vcmp.eq.s32.totalorder %v23_v0, 0  ;;  %vm169_vm3 = vmmov 1   ;;  %vm38_vm7 = vcmp.lt.s32.totalorder %v23_v0, 0  ;;  %vm37_vm9 = vcmp.lt.s32.totalorder %v25_v1, 0  ;;  %s123_s0 = smov [#allocation5]  }
  0x16   :  { %vm39_vm4 = vmxor %vm28_vm0, %vm169_vm3  ;;  %vm32_vm5 = vcmp.le.f32.partialorder %v30_v2, %v31_v3  ;;  %vm42_vm11 = vcmp.ne.f32.partialorder %v23_v0, %v23_v0  ;;  %vm43_vm12 = vcmp.ne.f32.partialorder %v25_v1, %v25_v1  ;;  %s56_s20 = sshll.u32 %s123_s0, 4  ;;  %v124_v5 = vmov 2   ;;  %s57_s20 = int_to_ptr.vmem [resolvable:$true] %s56_s20 }
  0x17   :  { %vm148_vm6 = vmand %vm34_vm2, %vm28_vm0  ;;  %vm172_vm0 = vmmov 1   ;;  %s93_s21 = scalar_lea.vmem %s57_s20, 16  ;;  %s97_s22 = scalar_lea.vmem %s57_s20, 32 }
  0x18   :  { %vm33_vm8 = vmand %vm29_vm1, %vm32_vm5  ;;  %p94_p8 = scmp.ne.s32.totalorder %s57_s20, %s93_s21  ;;  %p98_p9 = scmp.lt.s32.totalorder %s57_s20, %s57_s20 }
  0x19   :  { %vm36_vm10 = vmor %vm33_vm8, %vm148_vm6  ;;  %p99_p10 = scmp.lt.s32.totalorder %s97_s22, %s93_s21 }
  0x1a   :  { %vm40_vm13 = vmor %vm38_vm7, %vm39_vm4 }
  0x1b   :  { %vm41_vm14 = vmand %vm37_vm9, %vm40_vm13  ;;  %p100_p11 = por %p99_p10, %p98_p9 }
  0x1c   :  { %vm44_vm15 = vmor %vm42_vm11, %vm43_vm12  ;;  %v47_v6 = vsel %vm41_vm14, 1, %v124_v5 }
  0x1d   :  { %vm45_vm3 = vmor %vm36_vm10, %vm44_vm15  ;;  %p101_p12 = pnand %p100_p11, %p94_p8 }
  0x1e   :  { %vm46_vm2 = vmxor %vm45_vm3, %vm172_vm0 }
  0x1f   :  { %v48_v7 = vsel %vm46_vm2, %v47_v6, 0 }
  0x20   :  { %49 = vst [vmem:[#allocation5] sm:$0x1] %v48_v7 }
  0x21   :  { %104 = shalt.err (!%p101_p12)
}
  0x22   :  { %s105_s25 = scalar_lea.hbm %s168_s1, 16 }
  0x23   :  { %p106_p13 = scmp.ne.s32.totalorder %s168_s1, %s105_s25  ;;  %p109_p0 = scmp.lt.u32.totalorder %s105_s25, %s168_s1 }
  0x25   :  { %p111_p1 = pnand %p109_p0, %p106_p13 }
  0x27   :  { %114 = shalt.err (!%p111_p1)
}
  0x28   :  { %59 = dma.vmem_to_hbm [thread:$0]  %s57_s20, 16, %s168_s1, [#allocation4]  }
  0x29   :  { %117 = dma.done.wait [#allocation4], 16  }
  0x2a   :  { %118 = vsyncadd [#allocation4], 4294967280 }
  0x2b   :  { %63 = vsyncpa [#allocation3], 1 }
  0x2c   :  { %64 = vsyncpa [#allocation4], 1 }

</bundles_post_ra>
